<compile_context>
chip_gen: v6e
topology: v6e:2x2x1
jax: 0.10.0
libtpu: 0.0.40
codegen_flags: <defaults>
</compile_context>

<pallas_src>
import functools

import jax
import jax.numpy as jnp
from jax.experimental import pallas as pl
from jax.experimental.pallas import tpu as pltpu


_LANE = 128
# Explicit scoped-VMEM budget; leaves headroom under v7x's 64 MiB physical VMEM
# (v5e's scoped default is only 16 MiB, so set it explicitly everywhere).
_VMEM_LIMIT = 48 * 1024 * 1024


def _round_up(x, m):
    return (x + m - 1) // m * m


# ---------------------------------------------------------------------------
# Pass 1: h = x @ W1 + b1 ; accumulate per-column sum / sum-of-squares across
#         batch tiles; on the last tile fold BN affine + dropout keep-scale
#         into a single (scale, shift) row pair.
# ---------------------------------------------------------------------------
def _linear1_stats_kernel(x_ref, w1_ref, b1_ref, gamma_ref, beta_ref,
                          h_ref, scale_ref, shift_ref, *,
                          tile_n, n_true, bn_eps, drp_p, needs_mask):
    i = pl.program_id(0)

    # MXU: bf16 operands, f32 accumulate.
    h = jnp.dot(x_ref[...].astype(jnp.bfloat16), w1_ref[...],
                preferred_element_type=jnp.float32) + b1_ref[...]
    h_ref[...] = h

    # Zero out padded batch rows so they don't pollute the batch statistics.
    if needs_mask:
        row = i * tile_n + jax.lax.broadcasted_iota(jnp.int32, (tile_n, 1), 0)
        h = jnp.where(row < n_true, h, 0.0)

    @pl.when(i == 0)
    def _init():
        scale_ref[...] = jnp.zeros_like(scale_ref)
        shift_ref[...] = jnp.zeros_like(shift_ref)

    # scale_ref carries sum(h), shift_ref carries sum(h*h) until the final
    # tile, where they are overwritten with the folded scale / shift.
    scale_ref[...] += jnp.sum(h, axis=0, keepdims=True)
    shift_ref[...] += jnp.sum(h * h, axis=0, keepdims=True)

    @pl.when(i == pl.num_programs(0) - 1)
    def _finalize():
        inv_n = jnp.float32(1.0 / n_true)
        mean = scale_ref[...] * inv_n
        var = shift_ref[...] * inv_n - mean * mean   # biased variance (torch BN train)
        rstd = jax.lax.rsqrt(var + jnp.float32(bn_eps))
        keep_scale = jnp.float32(1.0 / (1.0 - drp_p))
        g = gamma_ref[...] * rstd
        # ReLU(c*x) = c*ReLU(x) for c > 0, so the dropout keep-scale folds in.
        scale_ref[...] = g * keep_scale
        shift_ref[...] = (beta_ref[...] - mean * g) * keep_scale


# ---------------------------------------------------------------------------
# Pass 2: (h*scale + shift) -> ReLU -> dropout select -> @ W2 + b2.
# ---------------------------------------------------------------------------
def _apply_linear2_kernel(h_ref, scale_ref, shift_ref, rand_ref, w2_ref, b2_ref,
                          o_ref, *, drp_p):
    y = h_ref[...] * scale_ref[...] + shift_ref[...]
    y = jnp.maximum(y, 0.0)
    if drp_p > 0.0:
        # keep prob = 1 - p ; the 1/(1-p) rescale is already folded into scale/shift.
        y = jnp.where(rand_ref[...] >= jnp.float32(drp_p), y, 0.0)
    o_ref[...] = jnp.dot(y.astype(jnp.bfloat16), w2_ref[...],
                         preferred_element_type=jnp.float32) + b2_ref[...]


@functools.partial(jax.jit, static_argnames=("drp_p", "bn_eps", "tile_n"))
def mlp_forward(x, params, rand, *, drp_p=0.1, bn_eps=1e-5, tile_n=128):
    """Train-mode MLP forward.  x: (N, D0) f32.  rand: (N, D1) uniform [0,1)."""
    n, d0 = x.shape
    d1 = params["w1"].shape[1]
    d2 = params["w2"].shape[1]

    d1p = _round_up(d1, _LANE)           # lane-dense hidden dim
    d2p = _round_up(d2, _LANE)           # lane-dense output dim (no masked vst)
    tile_n = min(tile_n, _round_up(n, 8))
    n_pad = _round_up(n, tile_n)
    n_tiles = n_pad // tile_n

    f32 = jnp.float32
    xp = jnp.pad(x.astype(f32), ((0, n_pad - n), (0, 0)))
    w1p = jnp.pad(params["w1"].astype(f32), ((0, 0), (0, d1p - d1))).astype(jnp.bfloat16)
    b1p = jnp.pad(params["b1"].astype(f32), (0, d1p - d1)).reshape(1, d1p)
    gap = jnp.pad(params["gamma"].astype(f32), (0, d1p - d1)).reshape(1, d1p)
    bep = jnp.pad(params["beta"].astype(f32), (0, d1p - d1)).reshape(1, d1p)
    w2p = jnp.pad(params["w2"].astype(f32),
                  ((0, d1p - d1), (0, d2p - d2))).astype(jnp.bfloat16)
    b2p = jnp.pad(params["b2"].astype(f32), (0, d2p - d2)).reshape(1, d2p)
    # Padded dropout draws default to 1.0 ("keep"); padded cols are nulled by W2.
    rp = jnp.pad(rand.astype(f32), ((0, n_pad - n), (0, d1p - d1)),
                 constant_values=1.0)

    const = lambda i: (0, 0)
    rowblk = lambda i: (i, 0)

    # ---- pass 1: linear1 + batch statistics --------------------------------
    h, scale, shift = pl.pallas_call(
        functools.partial(_linear1_stats_kernel, tile_n=tile_n, n_true=n,
                          bn_eps=bn_eps, drp_p=drp_p,
                          needs_mask=(n_pad != n)),
        grid=(n_tiles,),
        in_specs=[
            pl.BlockSpec((tile_n, d0), rowblk),     # x tile
            pl.BlockSpec((d0, d1p), const),         # W1 (resident across tiles)
            pl.BlockSpec((1, d1p), const),          # b1
            pl.BlockSpec((1, d1p), const),          # gamma
            pl.BlockSpec((1, d1p), const),          # beta
        ],
        out_specs=[
            pl.BlockSpec((tile_n, d1p), rowblk),    # h tile
            pl.BlockSpec((1, d1p), const),          # folded scale (accumulator)
            pl.BlockSpec((1, d1p), const),          # folded shift (accumulator)
        ],
        out_shape=[
            jax.ShapeDtypeStruct((n_pad, d1p), jnp.float32),
            jax.ShapeDtypeStruct((1, d1p), jnp.float32),
            jax.ShapeDtypeStruct((1, d1p), jnp.float32),
        ],
        compiler_params=pltpu.CompilerParams(
            dimension_semantics=("arbitrary",),     # stats accumulator carries over
            vmem_limit_bytes=_VMEM_LIMIT),
        cost_estimate=pl.CostEstimate(
            flops=2 * n_pad * d0 * d1p,
            transcendentals=0,
            bytes_accessed=4 * (n_pad * d0 + n_pad * d1p) + 2 * d0 * d1p),
    )(xp, w1p, b1p, gap, bep)

    # ---- pass 2: BN apply + ReLU + dropout + linear2 ------------------------
    out = pl.pallas_call(
        functools.partial(_apply_linear2_kernel, drp_p=drp_p),
        grid=(n_tiles,),
        in_specs=[
            pl.BlockSpec((tile_n, d1p), rowblk),    # h tile
            pl.BlockSpec((1, d1p), const),          # scale
            pl.BlockSpec((1, d1p), const),          # shift
            pl.BlockSpec((tile_n, d1p), rowblk),    # dropout uniforms
            pl.BlockSpec((d1p, d2p), const),        # W2 (resident)
            pl.BlockSpec((1, d2p), const),          # b2
        ],
        out_specs=pl.BlockSpec((tile_n, d2p), rowblk),
        out_shape=jax.ShapeDtypeStruct((n_pad, d2p), jnp.float32),
        compiler_params=pltpu.CompilerParams(
            dimension_semantics=("parallel",),      # independent tiles -> v7x megacore
            vmem_limit_bytes=_VMEM_LIMIT),
        cost_estimate=pl.CostEstimate(
            flops=2 * n_pad * d1p * d2p,
            transcendentals=0,
            bytes_accessed=4 * (2 * n_pad * d1p + n_pad * d2p) + 2 * d1p * d2p),
    )(h, scale, shift, rp, w2p, b2p)

    return out[:n, :d2]


def mlp_reference(x, params, rand, *, drp_p=0.1, bn_eps=1e-5):
    """Pure-JAX reference with the same bf16-matmul / f32-elementwise recipe."""
    h = jnp.dot(x.astype(jnp.bfloat16), params["w1"].astype(jnp.bfloat16),
                preferred_element_type=jnp.float32) + params["b1"]
    mean = jnp.mean(h, axis=0, keepdims=True)
    var = jnp.mean(h * h, axis=0, keepdims=True) - mean * mean
    hbn = (h - mean) * jax.lax.rsqrt(var + bn_eps) * params["gamma"] + params["beta"]
    a = jnp.maximum(hbn, 0.0)
    a = jnp.where(rand >= drp_p, a / (1.0 - drp_p), 0.0)
    return jnp.dot(a.astype(jnp.bfloat16), params["w2"].astype(jnp.bfloat16),
                   preferred_element_type=jnp.float32) + params["b2"]


def init_params(key, dimension_list):
    """Deterministic init matching the shapes implied by MLP.__init__."""
    d0, d1, d2 = dimension_list
    k1, k2, k3, k4, k5, k6 = jax.random.split(key, 6)
    # nn.Linear stores weight as (out, in); we keep the transposed (in, out) layout.
    bound1 = 1.0 / jnp.sqrt(d0)
    bound2 = 1.0 / jnp.sqrt(d1)
    return {
        "w1": jax.random.uniform(k1, (d0, d1), jnp.float32, -bound1, bound1),
        "b1": jax.random.uniform(k2, (d1,), jnp.float32, -bound1, bound1),
        "gamma": jnp.ones((d1,), jnp.float32) + 0.1 * jax.random.normal(k3, (d1,), jnp.float32),
        "beta": 0.1 * jax.random.normal(k4, (d1,), jnp.float32),
        "w2": jax.random.uniform(k5, (d1, d2), jnp.float32, -bound2, bound2),
        "b2": jax.random.uniform(k6, (d2,), jnp.float32, -bound2, bound2),
    }


if __name__ == "__main__":
    key = jax.random.PRNGKey(0)
    kx, kp, kd = jax.random.split(key, 3)

    # dimension_list -> Linear(32,64), BN(64), ReLU, Dropout(0.1), Linear(64,16)
    dimension_list = [32, 64, 16]
    N = 256  # batch rows; 2 grid tiles of 128 rows each
    x = jax.random.normal(kx, (N, dimension_list[0]), dtype=jnp.float32)
    params = init_params(kp, dimension_list)
    rand = jax.random.uniform(kd, (N, dimension_list[1]), dtype=jnp.float32)

    out = mlp_forward(x, params, rand, drp_p=0.1)
    out = jax.block_until_ready(out)
    assert out.shape == (N, dimension_list[-1])
    assert bool(jnp.isfinite(out).all())

    ref = mlp_reference(x, params, rand, drp_p=0.1)
    max_err = float(jnp.abs(out - ref).max())
    assert bool(jnp.allclose(out, ref, rtol=5e-2, atol=5e-2)), max_err

    print("KERNEL_OK")
</pallas_src>

<mosaic_0001>
module attributes {stable_mosaic.version = 11 : i64} {
  func.func @_linear1_stats_kernel(%arg0: i32, %arg1: memref<128x32xf32, #tpu.memory_space<vmem>>, %arg2: memref<32x128xbf16, #tpu.memory_space<vmem>>, %arg3: memref<1x128xf32, #tpu.memory_space<vmem>>, %arg4: memref<1x128xf32, #tpu.memory_space<vmem>>, %arg5: memref<1x128xf32, #tpu.memory_space<vmem>>, %arg6: memref<128x128xf32, #tpu.memory_space<vmem>>, %arg7: memref<1x128xf32, #tpu.memory_space<vmem>>, %arg8: memref<1x128xf32, #tpu.memory_space<vmem>>) attributes {dimension_semantics = [#tpu.dimension_semantics<arbitrary>], iteration_bounds = array<i64: 2>, scalar_prefetch = 0 : i64, scratch_operands = 0 : i64, tpu.core_type = #tpu.core_type<tc>, window_params = [{transform_indices = @transform_0, window_bounds = array<i64: 128, 32>}, {pipeline_mode = #tpu.pipeline_mode<synchronous>, transform_indices = @transform_1, window_bounds = array<i64: 32, 128>}, {pipeline_mode = #tpu.pipeline_mode<synchronous>, transform_indices = @transform_2, window_bounds = array<i64: 1, 128>}, {pipeline_mode = #tpu.pipeline_mode<synchronous>, transform_indices = @transform_3, window_bounds = array<i64: 1, 128>}, {pipeline_mode = #tpu.pipeline_mode<synchronous>, transform_indices = @transform_4, window_bounds = array<i64: 1, 128>}, {transform_indices = @transform_5, window_bounds = array<i64: 128, 128>}, {pipeline_mode = #tpu.pipeline_mode<synchronous>, transform_indices = @transform_6, window_bounds = array<i64: 1, 128>}, {pipeline_mode = #tpu.pipeline_mode<synchronous>, transform_indices = @transform_7, window_bounds = array<i64: 1, 128>}]} {
    %c0 = arith.constant 0 : index
    %c0_0 = arith.constant 0 : index
    %0 = vector.load %arg1[%c0, %c0_0] : memref<128x32xf32, #tpu.memory_space<vmem>>, vector<128x32xf32>
    %1 = arith.truncf %0 : vector<128x32xf32> to vector<128x32xbf16>
    %c0_1 = arith.constant 0 : index
    %c0_2 = arith.constant 0 : index
    %2 = vector.load %arg2[%c0_1, %c0_2] : memref<32x128xbf16, #tpu.memory_space<vmem>>, vector<32x128xbf16>
    %cst = arith.constant dense<0.000000e+00> : vector<128x128xf32>
    %3 = tpu.matmul %1, %2, %cst {dimension_numbers = #tpu.dot_dimension_numbers<[1], [0], [0], [1], [0, 0, 1, 1], [], []>} : vector<128x32xbf16>, vector<32x128xbf16>, vector<128x128xf32> -> vector<128x128xf32>
    %c0_3 = arith.constant 0 : index
    %c0_4 = arith.constant 0 : index
    %4 = vector.load %arg3[%c0_3, %c0_4] : memref<1x128xf32, #tpu.memory_space<vmem>>, vector<1x128xf32>
    %5 = vector.broadcast %4 : vector<1x128xf32> to vector<128x128xf32>
    %6 = arith.addf %3, %5 : vector<128x128xf32>
    %c0_5 = arith.constant 0 : index
    %c0_6 = arith.constant 0 : index
    %7 = vector.load %arg6[%c0_5, %c0_6] : memref<128x128xf32, #tpu.memory_space<vmem>>, vector<128x128xf32>
    tpu.vector_store %arg6[%c0_5, %c0_6], %6 {strides = array<i32>} : memref<128x128xf32, #tpu.memory_space<vmem>>, vector<128x128xf32>,
    %c0_i32 = arith.constant 0 : i32
    %8 = arith.cmpi eq, %arg0, %c0_i32 : i32
    %9 = arith.extui %8 : i1 to i32
    %c0_i32_7 = arith.constant 0 : i32
    %10 = arith.cmpi ne, %9, %c0_i32_7 : i32
    scf.if %10 {
      %cst_19 = arith.constant 0.000000e+00 : f32
      %25 = vector.broadcast %cst_19 : f32 to vector<1x128xf32>
      %c0_20 = arith.constant 0 : index
      %c0_21 = arith.constant 0 : index
      %26 = vector.load %arg7[%c0_20, %c0_21] : memref<1x128xf32, #tpu.memory_space<vmem>>, vector<1x128xf32>
      tpu.vector_store %arg7[%c0_20, %c0_21], %25 {strides = array<i32>} : memref<1x128xf32, #tpu.memory_space<vmem>>, vector<1x128xf32>,
      %cst_22 = arith.constant 0.000000e+00 : f32
      %27 = vector.broadcast %cst_22 : f32 to vector<1x128xf32>
      %c0_23 = arith.constant 0 : index
      %c0_24 = arith.constant 0 : index
      %28 = vector.load %arg8[%c0_23, %c0_24] : memref<1x128xf32, #tpu.memory_space<vmem>>, vector<1x128xf32>
      tpu.vector_store %arg8[%c0_23, %c0_24], %27 {strides = array<i32>} : memref<1x128xf32, #tpu.memory_space<vmem>>, vector<1x128xf32>,
    } else {
    }
    %c0_8 = arith.constant 0 : index
    %c0_9 = arith.constant 0 : index
    %11 = vector.load %arg7[%c0_8, %c0_9] : memref<1x128xf32, #tpu.memory_space<vmem>>, vector<1x128xf32>
    %cst_10 = arith.constant dense<0.000000e+00> : vector<128xf32>
    %12 = vector.multi_reduction <add>, %6, %cst_10 [0] : vector<128x128xf32> to vector<128xf32>
    %13 = vector.shape_cast %12 : vector<128xf32> to vector<1x128xf32>
    %14 = arith.addf %11, %13 : vector<1x128xf32>
    %c0_11 = arith.constant 0 : index
    %c0_12 = arith.constant 0 : index
    %15 = vector.load %arg7[%c0_11, %c0_12] : memref<1x128xf32, #tpu.memory_space<vmem>>, vector<1x128xf32>
    tpu.vector_store %arg7[%c0_11, %c0_12], %14 {strides = array<i32>} : memref<1x128xf32, #tpu.memory_space<vmem>>, vector<1x128xf32>,
    %c0_13 = arith.constant 0 : index
    %c0_14 = arith.constant 0 : index
    %16 = vector.load %arg8[%c0_13, %c0_14] : memref<1x128xf32, #tpu.memory_space<vmem>>, vector<1x128xf32>
    %17 = arith.mulf %6, %6 : vector<128x128xf32>
    %cst_15 = arith.constant dense<0.000000e+00> : vector<128xf32>
    %18 = vector.multi_reduction <add>, %17, %cst_15 [0] : vector<128x128xf32> to vector<128xf32>
    %19 = vector.shape_cast %18 : vector<128xf32> to vector<1x128xf32>
    %20 = arith.addf %16, %19 : vector<1x128xf32>
    %c0_16 = arith.constant 0 : index
    %c0_17 = arith.constant 0 : index
    %21 = vector.load %arg8[%c0_16, %c0_17] : memref<1x128xf32, #tpu.memory_space<vmem>>, vector<1x128xf32>
    tpu.vector_store %arg8[%c0_16, %c0_17], %20 {strides = array<i32>} : memref<1x128xf32, #tpu.memory_space<vmem>>, vector<1x128xf32>,
    %c1_i32 = arith.constant 1 : i32
    %22 = arith.cmpi eq, %arg0, %c1_i32 : i32
    %23 = arith.extui %22 : i1 to i32
    %c0_i32_18 = arith.constant 0 : i32
    %24 = arith.cmpi ne, %23, %c0_i32_18 : i32
    scf.if %24 {
      %c0_19 = arith.constant 0 : index
      %c0_20 = arith.constant 0 : index
      %25 = vector.load %arg7[%c0_19, %c0_20] : memref<1x128xf32, #tpu.memory_space<vmem>>, vector<1x128xf32>
      %cst_21 = arith.constant 3.906250e-03 : f32
      %26 = vector.broadcast %cst_21 : f32 to vector<1x128xf32>
      %27 = arith.mulf %25, %26 : vector<1x128xf32>
      %c0_22 = arith.constant 0 : index
      %c0_23 = arith.constant 0 : index
      %28 = vector.load %arg8[%c0_22, %c0_23] : memref<1x128xf32, #tpu.memory_space<vmem>>, vector<1x128xf32>
      %cst_24 = arith.constant 3.906250e-03 : f32
      %29 = vector.broadcast %cst_24 : f32 to vector<1x128xf32>
      %30 = arith.mulf %28, %29 : vector<1x128xf32>
      %31 = arith.mulf %27, %27 : vector<1x128xf32>
      %32 = arith.subf %30, %31 : vector<1x128xf32>
      %cst_25 = arith.constant 9.99999974E-6 : f32
      %33 = vector.broadcast %cst_25 : f32 to vector<1x128xf32>
      %34 = arith.addf %32, %33 : vector<1x128xf32>
      %35 = math.rsqrt %34 : vector<1x128xf32>
      %c0_26 = arith.constant 0 : index
      %c0_27 = arith.constant 0 : index
      %36 = vector.load %arg4[%c0_26, %c0_27] : memref<1x128xf32, #tpu.memory_space<vmem>>, vector<1x128xf32>
      %37 = arith.mulf %36, %35 : vector<1x128xf32>
      %cst_28 = arith.constant 1.11111116 : f32
      %38 = vector.broadcast %cst_28 : f32 to vector<1x128xf32>
      %39 = arith.mulf %37, %38 : vector<1x128xf32>
      %c0_29 = arith.constant 0 : index
      %c0_30 = arith.constant 0 : index
      %40 = vector.load %arg7[%c0_29, %c0_30] : memref<1x128xf32, #tpu.memory_space<vmem>>, vector<1x128xf32>
      tpu.vector_store %arg7[%c0_29, %c0_30], %39 {strides = array<i32>} : memref<1x128xf32, #tpu.memory_space<vmem>>, vector<1x128xf32>,
      %c0_31 = arith.constant 0 : index
      %c0_32 = arith.constant 0 : index
      %41 = vector.load %arg5[%c0_31, %c0_32] : memref<1x128xf32, #tpu.memory_space<vmem>>, vector<1x128xf32>
      %42 = arith.mulf %27, %37 : vector<1x128xf32>
      %43 = arith.subf %41, %42 : vector<1x128xf32>
      %cst_33 = arith.constant 1.11111116 : f32
      %44 = vector.broadcast %cst_33 : f32 to vector<1x128xf32>
      %45 = arith.mulf %43, %44 : vector<1x128xf32>
      %c0_34 = arith.constant 0 : index
      %c0_35 = arith.constant 0 : index
      %46 = vector.load %arg8[%c0_34, %c0_35] : memref<1x128xf32, #tpu.memory_space<vmem>>, vector<1x128xf32>
      tpu.vector_store %arg8[%c0_34, %c0_35], %45 {strides = array<i32>} : memref<1x128xf32, #tpu.memory_space<vmem>>, vector<1x128xf32>,
    } else {
    }
    return
  }
  func.func @transform_0(%arg0: i32) -> (i32, i32) {
    %c0_i32 = arith.constant 0 : i32
    %c0_i32_0 = arith.constant 0 : i32
    return %arg0, %c0_i32 : i32, i32
  }
  func.func @transform_1(%arg0: i32) -> (i32, i32) {
    %c0_i32 = arith.constant 0 : i32
    %c0_i32_0 = arith.constant 0 : i32
    %c0_i32_1 = arith.constant 0 : i32
    return %c0_i32, %c0_i32_0 : i32, i32
  }
  func.func @transform_2(%arg0: i32) -> (i32, i32) {
    %c0_i32 = arith.constant 0 : i32
    %c0_i32_0 = arith.constant 0 : i32
    %c0_i32_1 = arith.constant 0 : i32
    return %c0_i32, %c0_i32_0 : i32, i32
  }
  func.func @transform_3(%arg0: i32) -> (i32, i32) {
    %c0_i32 = arith.constant 0 : i32
    %c0_i32_0 = arith.constant 0 : i32
    %c0_i32_1 = arith.constant 0 : i32
    return %c0_i32, %c0_i32_0 : i32, i32
  }
  func.func @transform_4(%arg0: i32) -> (i32, i32) {
    %c0_i32 = arith.constant 0 : i32
    %c0_i32_0 = arith.constant 0 : i32
    %c0_i32_1 = arith.constant 0 : i32
    return %c0_i32, %c0_i32_0 : i32, i32
  }
  func.func @transform_5(%arg0: i32) -> (i32, i32) {
    %c0_i32 = arith.constant 0 : i32
    %c0_i32_0 = arith.constant 0 : i32
    return %arg0, %c0_i32 : i32, i32
  }
  func.func @transform_6(%arg0: i32) -> (i32, i32) {
    %c0_i32 = arith.constant 0 : i32
    %c0_i32_0 = arith.constant 0 : i32
    %c0_i32_1 = arith.constant 0 : i32
    return %c0_i32, %c0_i32_0 : i32, i32
  }
  func.func @transform_7(%arg0: i32) -> (i32, i32) {
    %c0_i32 = arith.constant 0 : i32
    %c0_i32_0 = arith.constant 0 : i32
    %c0_i32_1 = arith.constant 0 : i32
    return %c0_i32, %c0_i32_0 : i32, i32
  }
}

module attributes {stable_mosaic.version = 11 : i64} {
  func.func @_apply_linear2_kernel(%arg0: i32, %arg1: memref<128x128xf32, #tpu.memory_space<vmem>>, %arg2: memref<1x128xf32, #tpu.memory_space<vmem>>, %arg3: memref<1x128xf32, #tpu.memory_space<vmem>>, %arg4: memref<128x128xf32, #tpu.memory_space<vmem>>, %arg5: memref<128x128xbf16, #tpu.memory_space<vmem>>, %arg6: memref<1x128xf32, #tpu.memory_space<vmem>>, %arg7: memref<128x128xf32, #tpu.memory_space<vmem>>) attributes {dimension_semantics = [#tpu.dimension_semantics<parallel>], iteration_bounds = array<i64: 2>, scalar_prefetch = 0 : i64, scratch_operands = 0 : i64, tpu.core_type = #tpu.core_type<tc>, window_params = [{transform_indices = @transform_0, window_bounds = array<i64: 128, 128>}, {pipeline_mode = #tpu.pipeline_mode<synchronous>, transform_indices = @transform_1, window_bounds = array<i64: 1, 128>}, {pipeline_mode = #tpu.pipeline_mode<synchronous>, transform_indices = @transform_2, window_bounds = array<i64: 1, 128>}, {transform_indices = @transform_3, window_bounds = array<i64: 128, 128>}, {pipeline_mode = #tpu.pipeline_mode<synchronous>, transform_indices = @transform_4, window_bounds = array<i64: 128, 128>}, {pipeline_mode = #tpu.pipeline_mode<synchronous>, transform_indices = @transform_5, window_bounds = array<i64: 1, 128>}, {transform_indices = @transform_6, window_bounds = array<i64: 128, 128>}]} {
    %c0 = arith.constant 0 : index
    %c0_0 = arith.constant 0 : index
    %0 = vector.load %arg1[%c0, %c0_0] : memref<128x128xf32, #tpu.memory_space<vmem>>, vector<128x128xf32>
    %c0_1 = arith.constant 0 : index
    %c0_2 = arith.constant 0 : index
    %1 = vector.load %arg2[%c0_1, %c0_2] : memref<1x128xf32, #tpu.memory_space<vmem>>, vector<1x128xf32>
    %2 = vector.broadcast %1 : vector<1x128xf32> to vector<128x128xf32>
    %3 = arith.mulf %0, %2 : vector<128x128xf32>
    %c0_3 = arith.constant 0 : index
    %c0_4 = arith.constant 0 : index
    %4 = vector.load %arg3[%c0_3, %c0_4] : memref<1x128xf32, #tpu.memory_space<vmem>>, vector<1x128xf32>
    %5 = vector.broadcast %4 : vector<1x128xf32> to vector<128x128xf32>
    %6 = arith.addf %3, %5 : vector<128x128xf32>
    %cst = arith.constant 0.000000e+00 : f32
    %7 = vector.broadcast %cst : f32 to vector<128x128xf32>
    %8 = arith.maximumf %6, %7 : vector<128x128xf32>
    %c0_5 = arith.constant 0 : index
    %c0_6 = arith.constant 0 : index
    %9 = vector.load %arg4[%c0_5, %c0_6] : memref<128x128xf32, #tpu.memory_space<vmem>>, vector<128x128xf32>
    %cst_7 = arith.constant 1.000000e-01 : f32
    %10 = vector.broadcast %cst_7 : f32 to vector<128x128xf32>
    %11 = arith.cmpf oge, %9, %10 : vector<128x128xf32>
    %cst_8 = arith.constant 0.000000e+00 : f32
    %12 = vector.broadcast %cst_8 : f32 to vector<128x128xf32>
    %13 = arith.select %11, %8, %12 : vector<128x128xi1>, vector<128x128xf32>
    %14 = arith.truncf %13 : vector<128x128xf32> to vector<128x128xbf16>
    %c0_9 = arith.constant 0 : index
    %c0_10 = arith.constant 0 : index
    %15 = vector.load %arg5[%c0_9, %c0_10] : memref<128x128xbf16, #tpu.memory_space<vmem>>, vector<128x128xbf16>
    %cst_11 = arith.constant dense<0.000000e+00> : vector<128x128xf32>
    %16 = tpu.matmul %14, %15, %cst_11 {dimension_numbers = #tpu.dot_dimension_numbers<[1], [0], [0], [1], [0, 0, 1, 1], [], []>} : vector<128x128xbf16>, vector<128x128xbf16>, vector<128x128xf32> -> vector<128x128xf32>
    %c0_12 = arith.constant 0 : index
    %c0_13 = arith.constant 0 : index
    %17 = vector.load %arg6[%c0_12, %c0_13] : memref<1x128xf32, #tpu.memory_space<vmem>>, vector<1x128xf32>
    %18 = vector.broadcast %17 : vector<1x128xf32> to vector<128x128xf32>
    %19 = arith.addf %16, %18 : vector<128x128xf32>
    %c0_14 = arith.constant 0 : index
    %c0_15 = arith.constant 0 : index
    %20 = vector.load %arg7[%c0_14, %c0_15] : memref<128x128xf32, #tpu.memory_space<vmem>>, vector<128x128xf32>
    tpu.vector_store %arg7[%c0_14, %c0_15], %19 {strides = array<i32>} : memref<128x128xf32, #tpu.memory_space<vmem>>, vector<128x128xf32>,
    return
  }
  func.func @transform_0(%arg0: i32) -> (i32, i32) {
    %c0_i32 = arith.constant 0 : i32
    %c0_i32_0 = arith.constant 0 : i32
    return %arg0, %c0_i32 : i32, i32
  }
  func.func @transform_1(%arg0: i32) -> (i32, i32) {
    %c0_i32 = arith.constant 0 : i32
    %c0_i32_0 = arith.constant 0 : i32
    %c0_i32_1 = arith.constant 0 : i32
    return %c0_i32, %c0_i32_0 : i32, i32
  }
  func.func @transform_2(%arg0: i32) -> (i32, i32) {
    %c0_i32 = arith.constant 0 : i32
    %c0_i32_0 = arith.constant 0 : i32
    %c0_i32_1 = arith.constant 0 : i32
    return %c0_i32, %c0_i32_0 : i32, i32
  }
  func.func @transform_3(%arg0: i32) -> (i32, i32) {
    %c0_i32 = arith.constant 0 : i32
    %c0_i32_0 = arith.constant 0 : i32
    return %arg0, %c0_i32 : i32, i32
  }
  func.func @transform_4(%arg0: i32) -> (i32, i32) {
    %c0_i32 = arith.constant 0 : i32
    %c0_i32_0 = arith.constant 0 : i32
    %c0_i32_1 = arith.constant 0 : i32
    return %c0_i32, %c0_i32_0 : i32, i32
  }
  func.func @transform_5(%arg0: i32) -> (i32, i32) {
    %c0_i32 = arith.constant 0 : i32
    %c0_i32_0 = arith.constant 0 : i32
    %c0_i32_1 = arith.constant 0 : i32
    return %c0_i32, %c0_i32_0 : i32, i32
  }
  func.func @transform_6(%arg0: i32) -> (i32, i32) {
    %c0_i32 = arith.constant 0 : i32
    %c0_i32_0 = arith.constant 0 : i32
    return %arg0, %c0_i32 : i32, i32
  }
}

</mosaic_0001>

<bundles_post_ra>
// kernel: mlp_forward.2
= control target key start
LH: loop header
LB: loop body
LE: loop exit
PB: predicated region body
PF: predicated region fallthrough
CT: control target
= control target key end

     0   :  { %s742_s24 = smov 0   ;;  %s884_s0 = inlined_call_operand.vmem [shape: f32[256,32], index: 0, kind: input, shape index: {}]   ;;  %s885_s1 = inlined_call_operand.vmem [shape: bf16[32,128], index: 1, kind: input, shape index: {}]   ;;  %s886_s2 = inlined_call_operand.vmem [shape: f32[1,128], index: 2, kind: input, shape index: {}]   ;;  %s887_s3 = inlined_call_operand.vmem [shape: f32[1,128], index: 3, kind: input, shape index: {}]   ;;  %s888_s4 = inlined_call_operand.vmem [shape: f32[1,128], index: 4, kind: input, shape index: {}]   ;;  %s889_s5 = inlined_call_operand.vmem [shape: f32[256,128], index: 5, kind: output, shape index: {0}]   ;;  %s890_s6 = inlined_call_operand.vmem [shape: f32[1,128], index: 6, kind: output, shape index: {1}]   ;;  %s891_s7 = inlined_call_operand.vmem [shape: f32[1,128], index: 7, kind: output, shape index: {2}]  }
   0x1 LB: > { %s748_s25 = sadd.s32 4294967295, %s699_s24   ;;  %p626_p0 = scmp.ge.s32.totalorder %s699_s24, 1  ;;  %s699_s24 = sphi %s742_s24, %s18_s24  }
   0x2   : > { %p233_p1 = scmp.lt.s32.totalorder %s699_s24, 3 }
   0x4   : > { %p234_p2 = pnand %p626_p0, %p233_p1 }
   0x5   : > { %s627_s28 = sshll.u32 (!%p234_p2), %s748_s25, 4  ;;  %p642_p4 = scmp.ne.s32.totalorder (!%p234_p2), %s748_s25, 0 }
   0x6   : > { %237 = sbr.rel (%p234_p2) target bundleno = 315 (0x13b), region = 40  ;;  %p266_p3 = scmp.lt.s32.totalorder (!%p234_p2), %s627_s28, 31 }
   0xb   : > { %v689_v0 = vld [vmem:[%s885_s1 + $0x8] sm:$0xff]   ;;  %v690_v1 = vld [vmem:[%s885_s1] sm:$0xff]   ;;  %s893_s28 = smov (!%p266_p3, %s627_s28), 31  ;;  %vm325_vm0 = vcmask 261120  }
   0xc   : > { %656 = vmatprep.subr.bf16.mxu0 %v689_v0  ;;  %676 = vmatprep.subr.bf16.mxu1 %v689_v0  ;;  %s628_s8 = sshll.u32 %s893_s28, 3  ;;  %v631_v26 = vld [vmem:[%s886_s2] ss:$0 sm:$0xff] }
   0xd   : > { %657 = vmatpush3.bf16.msra.mxu0 %v689_v0  ;;  %678 = vmatpush3.bf16.msra.mxu1 %v689_v0  ;;  %s767_s11 = scalar_lea.vmem %s884_s0, %s628_s8  ;;  %s801_s16 = scalar_lea.vmem %s889_s5, %s628_s8 }
   0xe   : > { %658 = vmatprep.subr.bf16.mxu0 %v690_v1  ;;  %677 = vmatprep.subr.bf16.mxu1 %v690_v1  ;;  %v278_v2 = vld [vmem:[%s767_s11] sm:$0xff]  ;;  %v279_v3 = vld [vmem:[%s767_s11 + $0x8] sm:$0xff]  ;;  %v280_v7 = vld [vmem:[%s767_s11 + $0x10] sm:$0xff] }
   0xf   : > { %v286_v4 = vld [vmem:[%s767_s11 + $0x40] sm:$0xff]  ;;  %v294_v5 = vpack.c.bf16 %v279_v3, %v278_v2  ;;  %v287_v6 = vld [vmem:[%s767_s11 + $0x48] sm:$0xff]  ;;  %v281_v8 = vld [vmem:[%s767_s11 + $0x18] sm:$0xff] }
  0x10   : > { %v298_v9 = vpack.c.bf16 %v287_v6, %v286_v4  ;;  %v295_v10 = vpack.c.bf16 %v281_v8, %v280_v7  ;;  %v288_v11 = vld [vmem:[%s767_s11 + $0x50] sm:$0xff]  ;;  %v289_v12 = vld [vmem:[%s767_s11 + $0x58] sm:$0xff]  ;;  %v282_v13 = vld [vmem:[%s767_s11 + $0x20] sm:$0xff] }
  0x11   : > { %659 = vmatpush3.bf16.msra.mxu0 %v690_v1  ;;  %679 = vmatpush3.bf16.msra.mxu1 %v690_v1  ;;  %v299_v14 = vpack.c.bf16 %v289_v12, %v288_v11  ;;  %v283_v15 = vld [vmem:[%s767_s11 + $0x28] sm:$0xff]  ;;  %v290_v16 = vld [vmem:[%s767_s11 + $0x60] sm:$0xff]  ;;  %v284_v20 = vld [vmem:[%s767_s11 + $0x30] sm:$0xff] }
  0x12   : > { %660 = vmatprep.mubr.msk.bf16.mxu0 %vm325_vm0, %v294_v5  ;;  %v291_v17 = vld [vmem:[%s767_s11 + $0x68] sm:$0xff]  ;;  %668 = vmatprep.mubr.msk.bf16.mxu1 %vm325_vm0, %v298_v9  ;;  %v296_v18 = vpack.c.bf16 %v283_v15, %v282_v13  ;;  %v285_v21 = vld [vmem:[%s767_s11 + $0x38] sm:$0xff]  ;;  %v292_v22 = vld [vmem:[%s767_s11 + $0x70] sm:$0xff] }
  0x13   : > { %v300_v19 = vpack.c.bf16 %v291_v17, %v290_v16  ;;  %v293_v23 = vld [vmem:[%s767_s11 + $0x78] sm:$0xff]  ;;  %v297_v24 = vpack.c.bf16 %v285_v21, %v284_v20 }
  0x14   : > { %661 = vmatmul.mubr.msk.bf16.vlgmr.msra.gmra.mxu0 %vm325_vm0, %v295_v10  ;;  %669 = vmatmul.mubr.msk.bf16.vlgmr.msra.gmra.mxu1 %vm325_vm0, %v299_v14  ;;  %v301_v25 = vpack.c.bf16 %v293_v23, %v292_v22 }
  0x15   : > { %664 = vmatprep.mubr.msk.bf16.mxu0 %vm325_vm0, %v296_v18  ;;  %672 = vmatprep.mubr.msk.bf16.mxu1 %vm325_vm0, %v300_v19 }
  0x1c   : > { %665 = vmatmul.mubr.msk.bf16.gmra.mxu0 %vm325_vm0, %v297_v24  ;;  %673 = vmatmul.mubr.msk.bf16.gmra.mxu1 %vm325_vm0, %v301_v25 }
  0xd4   : > { %v662_v27 = vpop.f32.mrf.mxu0  ;;  %v670_v29 = vpop.f32.mrf.mxu1 }
  0xd5   : > { %v393_v28 = vadd.f32 %v662_v27, %v631_v26  ;;  %v803_v30 = vadd.f32 %v670_v29, %v631_v26 }
  0xd6   : > { %v384_v31 = vpop.f32.mrf.mxu0  ;;  %v416_v33 = vpop.f32.mrf.mxu1 }
  0xd7   : > { %449 = vst [vmem:[%s801_s16 + $0x10] sm:$0xff] %v393_v28  ;;  %v385_v32 = vadd.f32 %v631_v26, %v384_v31  ;;  %457 = vst [vmem:[%s801_s16 + $0x50] sm:$0xff] %v803_v30  ;;  %v808_v34 = vadd.f32 %v631_v26, %v416_v33 }
  0xd8   : > { %v663_v35 = vpop.f32.mrf.mxu0  ;;  %v671_v37 = vpop.f32.mrf.mxu1 }
  0xd9   : > { %447 = vst [vmem:[%s801_s16] sm:$0xff] %v385_v32  ;;  %v396_v36 = vadd.f32 %v663_v35, %v631_v26  ;;  %455 = vst [vmem:[%s801_s16 + $0x40] sm:$0xff] %v808_v34  ;;  %v813_v38 = vadd.f32 %v671_v37, %v631_v26 }
  0xda   : > { %v387_v39 = vpop.f32.mrf.mxu0  ;;  %v419_v41 = vpop.f32.mrf.mxu1 }
  0xdb   : > { %450 = vst [vmem:[%s801_s16 + $0x18] sm:$0xff] %v396_v36  ;;  %v388_v40 = vadd.f32 %v631_v26, %v387_v39  ;;  %458 = vst [vmem:[%s801_s16 + $0x58] sm:$0xff] %v813_v38  ;;  %v420_v42 = vadd.f32 %v631_v26, %v419_v41 }
  0xdc   : > { %v666_v43 = vpop.f32.mrf.mxu0  ;;  %v674_v45 = vpop.f32.mrf.mxu1 }
  0xdd   : > { %448 = vst [vmem:[%s801_s16 + $0x8] sm:$0xff] %v388_v40  ;;  %v409_v44 = vadd.f32 %v666_v43, %v631_v26  ;;  %456 = vst [vmem:[%s801_s16 + $0x48] sm:$0xff] %v420_v42  ;;  %v820_v46 = vadd.f32 %v674_v45, %v631_v26 }
  0xde   : > { %v400_v47 = vpop.f32.mrf.mxu0  ;;  %v432_v49 = vpop.f32.mrf.mxu1 }
  0xdf   : > { %453 = vst [vmem:[%s801_s16 + $0x30] sm:$0xff] %v409_v44  ;;  %v401_v48 = vadd.f32 %v631_v26, %v400_v47  ;;  %461 = vst [vmem:[%s801_s16 + $0x70] sm:$0xff] %v820_v46  ;;  %v433_v50 = vadd.f32 %v631_v26, %v432_v49 }
  0xe0   : > { %v667_v51 = vpop.f32.mrf.mxu0  ;;  %v675_v53 = vpop.f32.mrf.mxu1 }
  0xe1   : > { %451 = vst [vmem:[%s801_s16 + $0x20] sm:$0xff] %v401_v48  ;;  %v412_v52 = vadd.f32 %v667_v51, %v631_v26  ;;  %459 = vst [vmem:[%s801_s16 + $0x60] sm:$0xff] %v433_v50  ;;  %v444_v54 = vadd.f32 %v675_v53, %v631_v26  ;;  %466 = sbr.rel (%p642_p4) target bundleno = 232 (0xe8), region = 44 }
  0xe2   : > { %v403_v55 = vpop.f32.mrf.mxu0  ;;  %v435_v57 = vpop.f32.mrf.mxu1 }
  0xe3   : > { %454 = vst [vmem:[%s801_s16 + $0x38] sm:$0xff] %v412_v52  ;;  %v404_v56 = vadd.f32 %v631_v26, %v403_v55  ;;  %462 = vst [vmem:[%s801_s16 + $0x78] sm:$0xff] %v444_v54  ;;  %v436_v58 = vadd.f32 %v631_v26, %v435_v57 }
  0xe5   : > { %452 = vst [vmem:[%s801_s16 + $0x28] sm:$0xff] %v404_v56  ;;  %460 = vst [vmem:[%s801_s16 + $0x68] sm:$0xff] %v436_v58 }
  0xe6   : > { %v701_v59 = vmov 0.0  }
  0xe7   : > { %467 = vst [vmem:[%s890_s6] sm:$0x1] %v701_v59  ;;  %468 = vst [vmem:[%s891_s7] sm:$0x1] %v701_v59 }
  0xe8 PF: > { %v470_v60 = vadd.f32 %v388_v40, %v385_v32  ;;  %v494_v61 = vmul.f32 %v385_v32, %v385_v32  ;;  %v495_v62 = vmul.f32 %v388_v40, %v388_v40  ;;  %v496_v0 = vmul.f32 %v393_v28, %v393_v28  ;;  %p643_p5 = scmp.ne.s32.totalorder %s748_s25, 1 }
  0xe9   : > { %v497_v2 = vmul.f32 %v396_v36, %v396_v36  ;;  %v498_v5 = vmul.f32 %v401_v48, %v401_v48  ;;  %v499_v8 = vmul.f32 %v404_v56, %v404_v56  ;;  %v500_v11 = vmul.f32 %v409_v44, %v409_v44 }
  0xea   : > { %v471_v63 = vadd.f32 %v470_v60, %v393_v28  ;;  %v510_v3 = vadd.f32 %v495_v62, %v494_v61  ;;  %v501_v14 = vmul.f32 %v412_v52, %v412_v52  ;;  %v502_v17 = vmul.f32 %v808_v34, %v808_v34 }
  0xeb   : > { %v503_v20 = vmul.f32 %v420_v42, %v420_v42  ;;  %v504_v23 = vmul.f32 %v803_v30, %v803_v30  ;;  %v505_v26 = vmul.f32 %v813_v38, %v813_v38  ;;  %v506_v29 = vmul.f32 %v433_v50, %v433_v50 }
  0xec   : > { %v472_v1 = vadd.f32 %v471_v63, %v396_v36  ;;  %v511_v6 = vadd.f32 %v510_v3, %v496_v0  ;;  %v507_v33 = vmul.f32 %v436_v58, %v436_v58  ;;  %v508_v36 = vmul.f32 %v820_v46, %v820_v46 }
  0xed   : > { %v509_v39 = vmul.f32 %v444_v54, %v444_v54 }
  0xee   : > { %v473_v4 = vadd.f32 %v472_v1, %v401_v48  ;;  %v512_v9 = vadd.f32 %v511_v6, %v497_v2  ;;  %v469_v51 = vld [vmem:[%s890_s6] sm:$0x1] }
  0xf0   : > { %v474_v7 = vadd.f32 %v473_v4, %v404_v56  ;;  %v513_v12 = vadd.f32 %v512_v9, %v498_v5 }
  0xf2   : > { %v475_v10 = vadd.f32 %v474_v7, %v409_v44  ;;  %v514_v15 = vadd.f32 %v513_v12, %v499_v8 }
  0xf4   : > { %v476_v13 = vadd.f32 %v475_v10, %v412_v52  ;;  %v515_v18 = vadd.f32 %v514_v15, %v500_v11 }
  0xf6   : > { %v477_v16 = vadd.f32 %v476_v13, %v808_v34  ;;  %v516_v21 = vadd.f32 %v515_v18, %v501_v14 }
  0xf8   : > { %v478_v19 = vadd.f32 %v477_v16, %v420_v42  ;;  %v517_v24 = vadd.f32 %v516_v21, %v502_v17 }
  0xfa   : > { %v479_v22 = vadd.f32 %v478_v19, %v803_v30  ;;  %v518_v27 = vadd.f32 %v517_v24, %v503_v20 }
  0xfc   : > { %v480_v25 = vadd.f32 %v479_v22, %v813_v38  ;;  %v519_v31 = vadd.f32 %v518_v27, %v504_v23 }
  0xfe   : > { %v481_v28 = vadd.f32 %v480_v25, %v433_v50  ;;  %v520_v34 = vadd.f32 %v519_v31, %v505_v26 }
 0x100   : > { %v482_v32 = vadd.f32 %v481_v28, %v436_v58  ;;  %v521_v37 = vadd.f32 %v520_v34, %v506_v29 }
 0x102   : > { %v483_v35 = vadd.f32 %v482_v32, %v820_v46  ;;  %v522_v40 = vadd.f32 %v521_v37, %v507_v33 }
 0x104   : > { %v484_v30 = vadd.f32 %v483_v35, %v444_v54  ;;  %v523_v42 = vadd.f32 %v522_v40, %v508_v36  ;;  %v493_v54 = vld [vmem:[%s891_s7] sm:$0x1] }
 0x106   : > { %v485_v41 = vrot.slane %v484_v30, 4  ;;  %v524_v38 = vadd.f32 %v523_v42, %v509_v39 }
 0x108   : > { %v486_v43 = vadd.f32 %v485_v41, %v484_v30  ;;  %v525_v45 = vrot.slane %v524_v38, 4 }
 0x10a   : > { %v487_v44 = vrot.slane %v486_v43, 2  ;;  %v526_v48 = vadd.f32 %v525_v45, %v524_v38 }
 0x10c   : > { %v488_v47 = vadd.f32 %v487_v44, %v486_v43  ;;  %v527_v50 = vrot.slane %v526_v48, 2 }
 0x10e   : > { %v489_v49 = vrot.slane %v488_v47, 1  ;;  %v528_v46 = vadd.f32 %v527_v50, %v526_v48 }
 0x110   : > { %v490_v52 = vadd.f32 %v489_v49, %v488_v47  ;;  %v529_v55 = vrot.slane %v528_v46, 1 }
 0x112   : > { %v491_v53 = vadd.f32 %v490_v52, %v469_v51  ;;  %v530_v56 = vadd.f32 %v529_v55, %v528_v46  ;;  %536 = sbr.rel (%p643_p5) target bundleno = 315 (0x13b), region = 48 }
 0x114   : > { %492 = vst [vmem:[%s890_s6] sm:$0x1] %v491_v53  ;;  %v531_v57 = vadd.f32 %v530_v56, %v493_v54 }
 0x116   : > { %532 = vst [vmem:[%s891_s7] sm:$0x1] %v531_v57 }
 0x117   : > { %v545_v1 = vld [vmem:[%s887_s3] sm:$0x1] }
 0x118   : > { %v549_v4 = vld [vmem:[%s888_s4] sm:$0x1] }
 0x11b   : > { %v537_v58 = vld [vmem:[%s890_s6] sm:$0x1] }
 0x11c   : > { %v538_v60 = vmul.f32 0.00390625, %v537_v58 }
 0x11d   : > { %v539_v59 = vld [vmem:[%s891_s7] sm:$0x1] }
 0x11e   : > { %v540_v61 = vmul.f32 0.00390625, %v539_v59  ;;  %v541_v62 = vmul.f32 %v538_v60, %v538_v60 }
 0x120   : > { %v542_v63 = vsub.f32 %v540_v61, %v541_v62 }
 0x122   : > { %v543_v0 = vadd.f32 1e-05, %v542_v63 }
 0x124   : > { %691 = vrsqrt.f32 %v543_v0 }
 0x131   : > { %v692_v2 = vpop.eup %691 }
 0x132   : > { %v546_v3 = vmul.f32 %v692_v2, %v545_v1 }
 0x134   : > { %v547_v5 = vmul.f32 1.1111112, %v546_v3  ;;  %v550_v6 = vmul.f32 %v546_v3, %v538_v60 }
 0x136   : > { %548 = vst [vmem:[%s890_s6] sm:$0x1] %v547_v5  ;;  %v551_v7 = vsub.f32 %v549_v4, %v550_v6 }
 0x138   : > { %v552_v8 = vmul.f32 1.1111112, %v551_v7 }
 0x13a   : > { %553 = vst [vmem:[%s891_s7] sm:$0x1] %v552_v8 }
 0x13b PF: > { %s18_s24 = sadd.s32 1, %s699_s24  }
 0x13c   : > { %p15_p6 = scmp.ge.s32.totalorder %s18_s24, 4  }
 0x13e   :  { %17 = sbr.rel (!%p15_p6) target bundleno = 1 (0x1), region = 94 }

// kernel: mlp_forward.3
= control target key start
LH: loop header
LB: loop body
LE: loop exit
PB: predicated region body
PF: predicated region fallthrough
CT: control target
= control target key end

     0   :  { %s835_s21 = smov 0   ;;  %s1007_s0 = inlined_call_operand.vmem [shape: f32[256,128], index: 0, kind: input, shape index: {}]   ;;  %s1008_s1 = inlined_call_operand.vmem [shape: f32[1,128], index: 1, kind: input, shape index: {}]   ;;  %s1009_s2 = inlined_call_operand.vmem [shape: f32[1,128], index: 2, kind: input, shape index: {}]   ;;  %s1010_s3 = inlined_call_operand.vmem [shape: f32[256,128], index: 3, kind: input, shape index: {}]   ;;  %s1011_s4 = inlined_call_operand.vmem [shape: bf16[128,128], index: 4, kind: input, shape index: {}]   ;;  %s1012_s5 = inlined_call_operand.vmem [shape: f32[1,128], index: 5, kind: input, shape index: {}]   ;;  %s1013_s6 = inlined_call_operand.vmem [shape: f32[256,128], index: 6, kind: output, shape index: {}]  }
   0x1 LB: > { %s664_s22 = sadd.s32 4294967295, %s798_s21   ;;  %p668_p0 = scmp.ge.s32.totalorder %s798_s21, 1  ;;  %s798_s21 = sphi %s835_s21, %s16_s21  }
   0x2   : > { %p224_p1 = scmp.lt.s32.totalorder %s798_s21, 3 }
   0x4   : > { %p225_p2 = pnand %p668_p0, %p224_p1 }
   0x5   : > { %s669_s25 = sshll.u32 (!%p225_p2), %s664_s22, 4 }
   0x6   : > { %228 = sbr.rel (%p225_p2) target bundleno = 254 (0xfe), region = 44  ;;  %p260_p3 = scmp.lt.s32.totalorder (!%p225_p2), %s669_s25, 31 }
   0xb   : > { %v784_v0 = vld [vmem:[%s1011_s4 + $0x38] sm:$0xff]   ;;  %v785_v1 = vld [vmem:[%s1011_s4 + $0x30] sm:$0xff]   ;;  %s1021_s25 = smov (!%p260_p3, %s669_s25), 31  ;;  %v786_v2 = vld [vmem:[%s1011_s4 + $0x28] sm:$0xff]  }
   0xc   : > { %728 = vmatprep.subr.bf16.mxu0 %v784_v0  ;;  %760 = vmatprep.subr.bf16.mxu1 %v784_v0  ;;  %s852_s30 = sshll.u32 %s1021_s25, 3  ;;  %v787_v3 = vld [vmem:[%s1011_s4 + $0x20] sm:$0xff]   ;;  %v788_v17 = vld [vmem:[%s1011_s4 + $0x18] sm:$0xff]   ;;  %v789_v32 = vld [vmem:[%s1011_s4 + $0x10] sm:$0xff]  }
   0xd   : > { %729 = vmatpush3.bf16.msra.mxu0 %v784_v0  ;;  %768 = vmatpush3.bf16.msra.mxu1 %v784_v0  ;;  %s858_s9 = scalar_lea.vmem %s1007_s0, %s852_s30  ;;  %s864_s12 = scalar_lea.vmem %s1010_s3, %s852_s30  ;;  %v874_v6 = vld [vmem:[%s1008_s1] ss:$0 sm:$0xff]  ;;  %v790_v45 = vld [vmem:[%s1011_s4 + $0x8] sm:$0xff]  }
   0xe   : > { %730 = vmatprep.subr.bf16.mxu0 %v785_v1  ;;  %761 = vmatprep.subr.bf16.mxu1 %v785_v1  ;;  %v278_v4 = vld [vmem:[%s858_s9] sm:$0xff]  ;;  %v279_v5 = vld [vmem:[%s858_s9 + $0x8] sm:$0xff]  ;;  %v280_v25 = vld [vmem:[%s858_s9 + $0x10] sm:$0xff] }
   0xf   : > { %v301_v7 = vmul.f32 %v874_v6, %v278_v4  ;;  %v302_v8 = vmul.f32 %v874_v6, %v279_v5  ;;  %v881_v9 = vld [vmem:[%s1009_s2] ss:$0 sm:$0xff]  ;;  %v357_v11 = vld [vmem:[%s864_s12 + $0x8] sm:$0xff]  ;;  %v281_v27 = vld [vmem:[%s858_s9 + $0x18] sm:$0xff]  ;;  %v303_v34 = vmul.f32 %v874_v6, %v280_v25 }
  0x10   : > { %v356_v10 = vld [vmem:[%s864_s12] sm:$0xff]  ;;  %vm373_vm1 = vcmp.ge.f32.partialorder %v357_v11, 0.1  ;;  %v287_v13 = vld [vmem:[%s858_s9 + $0x48] sm:$0xff]  ;;  %v288_v28 = vld [vmem:[%s858_s9 + $0x50] sm:$0xff]  ;;  %v304_v37 = vmul.f32 %v874_v6, %v281_v27 }
  0x11   : > { %731 = vmatpush3.bf16.msra.mxu0 %v785_v1  ;;  %769 = vmatpush3.bf16.msra.mxu1 %v785_v1  ;;  %vm372_vm0 = vcmp.ge.f32.partialorder %v356_v10, 0.1  ;;  %v286_v12 = vld [vmem:[%s858_s9 + $0x40] sm:$0xff]  ;;  %v324_v14 = vadd.f32 %v881_v9, %v301_v7  ;;  %v325_v15 = vadd.f32 %v881_v9, %v302_v8  ;;  %v310_v18 = vmul.f32 %v874_v6, %v287_v13  ;;  %v365_v20 = vld [vmem:[%s864_s12 + $0x48] sm:$0xff]  ;;  %v289_v29 = vld [vmem:[%s858_s9 + $0x58] sm:$0xff] }
  0x12   : > { %732 = vmatprep.subr.bf16.mxu0 %v786_v2  ;;  %762 = vmatprep.subr.bf16.mxu1 %v786_v2  ;;  %v309_v16 = vmul.f32 %v874_v6, %v286_v12  ;;  %v364_v19 = vld [vmem:[%s864_s12 + $0x40] sm:$0xff]  ;;  %vm898_vm2 = vmpackc.low %vm373_vm1, %vm372_vm0  ;;  %vm381_vm4 = vcmp.ge.f32.partialorder %v365_v20, 0.1  ;;  %v283_v36 = vld [vmem:[%s858_s9 + $0x28] sm:$0xff]  ;;  %v311_v38 = vmul.f32 %v874_v6, %v288_v28  ;;  %v312_v39 = vmul.f32 %v874_v6, %v289_v29 }
  0x13   : > { %v340_v21 = vmax.f32 %v324_v14, 0.0  ;;  %v341_v22 = vmax.f32 %v325_v15, 0.0  ;;  %v333_v26 = vadd.f32 %v881_v9, %v310_v18  ;;  %vm380_vm3 = vcmp.ge.f32.partialorder %v364_v19, 0.1  ;;  %v282_v35 = vld [vmem:[%s858_s9 + $0x20] sm:$0xff]  ;;  %v291_v43 = vld [vmem:[%s858_s9 + $0x68] sm:$0xff] }
  0x14   : > { %v332_v24 = vadd.f32 %v881_v9, %v309_v16  ;;  %v290_v40 = vld [vmem:[%s858_s9 + $0x60] sm:$0xff]  ;;  %vm698_vm5 = vmpackc.low %vm381_vm4, %vm380_vm3  ;;  %v305_v42 = vmul.f32 %v874_v6, %v282_v35  ;;  %v306_v44 = vmul.f32 %v874_v6, %v283_v36  ;;  %v326_v46 = vadd.f32 %v881_v9, %v303_v34  ;;  %v358_v47 = vld [vmem:[%s864_s12 + $0x10] sm:$0xff] }
  0x15   : > { %733 = vmatpush3.bf16.msra.mxu0 %v786_v2  ;;  %770 = vmatpush3.bf16.msra.mxu1 %v786_v2  ;;  %v687_v30 = vpack.c.bf16 %v341_v22, %v340_v21  ;;  %v349_v33 = vmax.f32 %v333_v26, 0.0  ;;  %v313_v48 = vmul.f32 %v874_v6, %v290_v40  ;;  %v327_v49 = vadd.f32 %v881_v9, %v304_v37  ;;  %v359_v50 = vld [vmem:[%s864_s12 + $0x18] sm:$0xff]  ;;  %v366_v53 = vld [vmem:[%s864_s12 + $0x50] sm:$0xff]  ;;  %v791_v55 = vld [vmem:[%s1011_s4] sm:$0xff]  }
  0x16   : > { %734 = vmatprep.subr.bf16.mxu0 %v787_v3  ;;  %763 = vmatprep.subr.bf16.mxu1 %v787_v3  ;;  %v348_v31 = vmax.f32 %v332_v24, 0.0  ;;  %v334_v51 = vadd.f32 %v881_v9, %v311_v38  ;;  %v335_v52 = vadd.f32 %v881_v9, %v312_v39  ;;  %v314_v54 = vmul.f32 %v874_v6, %v291_v43  ;;  %v367_v56 = vld [vmem:[%s864_s12 + $0x58] sm:$0xff]  ;;  %v284_v58 = vld [vmem:[%s858_s9 + $0x30] sm:$0xff]  ;;  %v360_v2 = vld [vmem:[%s864_s12 + $0x20] sm:$0xff] }
  0x17   : > { %744 = vmatprep.mubr.msk.bf16.mxu0 %vm898_vm2, %v687_v30  ;;  %v328_v57 = vadd.f32 %v881_v9, %v305_v42  ;;  %vm374_vm6 = vcmp.ge.f32.partialorder %v358_v47, 0.1  ;;  %v329_v59 = vadd.f32 %v881_v9, %v306_v44  ;;  %v336_v60 = vadd.f32 %v881_v9, %v313_v48  ;;  %v285_v62 = vld [vmem:[%s858_s9 + $0x38] sm:$0xff]  ;;  %v292_v63 = vld [vmem:[%s858_s9 + $0x70] sm:$0xff]  ;;  %v361_v7 = vld [vmem:[%s864_s12 + $0x28] sm:$0xff] }
  0x18   : > { %v699_v41 = vpack.c.bf16 %v349_v33, %v348_v31  ;;  %v337_v61 = vadd.f32 %v881_v9, %v314_v54  ;;  %v293_v0 = vld [vmem:[%s858_s9 + $0x78] sm:$0xff]  ;;  %v342_v1 = vmax.f32 %v326_v46, 0.0  ;;  %vm375_vm7 = vcmp.ge.f32.partialorder %v359_v50, 0.1  ;;  %v368_v8 = vld [vmem:[%s864_s12 + $0x60] sm:$0xff]  ;;  %v369_v10 = vld [vmem:[%s864_s12 + $0x68] sm:$0xff]  ;;  %s986_s9 = scalar_lea.vmem %s1013_s6, %s852_s30 }
  0x19   : > { %735 = vmatpush3.bf16.msra.mxu0 %v787_v3  ;;  %771 = vmatpush3.bf16.msra.mxu1 %v787_v3  ;;  %vm382_vm8 = vcmp.ge.f32.partialorder %v366_v53, 0.1  ;;  %v343_v3 = vmax.f32 %v327_v49, 0.0  ;;  %v350_v4 = vmax.f32 %v334_v51, 0.0  ;;  %v351_v5 = vmax.f32 %v335_v52, 0.0  ;;  %vm957_vm12 = vmpackc.low %vm375_vm7, %vm374_vm6  ;;  %v362_v28 = vld [vmem:[%s864_s12 + $0x30] sm:$0xff] }
  0x1a   : > { %736 = vmatprep.subr.bf16.mxu0 %v788_v17  ;;  %764 = vmatprep.subr.bf16.mxu1 %v788_v17  ;;  %vm383_vm9 = vcmp.ge.f32.partialorder %v367_v56, 0.1  ;;  %v307_v11 = vmul.f32 %v874_v6, %v284_v58  ;;  %v308_v12 = vmul.f32 %v874_v6, %v285_v62  ;;  %v315_v13 = vmul.f32 %v874_v6, %v292_v63  ;;  %v363_v29 = vld [vmem:[%s864_s12 + $0x38] sm:$0xff]  ;;  %v370_v30 = vld [vmem:[%s864_s12 + $0x70] sm:$0xff]  ;;  %v677_v37 = vld [vmem:[%s1012_s5] ss:$0 sm:$0xff] }
  0x1b   : > { %752 = vmatprep.mubr.msk.bf16.mxu1 %vm698_vm5, %v699_v41  ;;  %v316_v14 = vmul.f32 %v874_v6, %v293_v0  ;;  %v344_v15 = vmax.f32 %v328_v57, 0.0  ;;  %v345_v16 = vmax.f32 %v329_v59, 0.0  ;;  %v353_v18 = vmax.f32 %v337_v61, 0.0  ;;  %vm963_vm15 = vmpackc.low %vm383_vm9, %vm382_vm8  ;;  %v371_v31 = vld [vmem:[%s864_s12 + $0x78] sm:$0xff] }
  0x1c   : > { %vm376_vm10 = vcmp.ge.f32.partialorder %v360_v2, 0.1  ;;  %vm377_vm11 = vcmp.ge.f32.partialorder %v361_v7, 0.1  ;;  %v690_v20 = vpack.c.bf16 %v343_v3, %v342_v1  ;;  %v702_v6 = vpack.c.bf16 %v351_v5, %v350_v4 }
  0x1d   : > { %737 = vmatpush3.bf16.msra.mxu0 %v788_v17  ;;  %772 = vmatpush3.bf16.msra.mxu1 %v788_v17  ;;  %v352_v17 = vmax.f32 %v336_v60, 0.0  ;;  %vm384_vm13 = vcmp.ge.f32.partialorder %v368_v8, 0.1  ;;  %vm385_vm14 = vcmp.ge.f32.partialorder %v369_v10, 0.1  ;;  %v330_v22 = vadd.f32 %v881_v9, %v307_v11  ;;  %vm692_vm0 = vmpackc.low %vm377_vm11, %vm376_vm10 }
  0x1e   : > { %738 = vmatprep.subr.bf16.mxu0 %v789_v32  ;;  %765 = vmatprep.subr.bf16.mxu1 %v789_v32  ;;  %v331_v23 = vadd.f32 %v881_v9, %v308_v12  ;;  %v338_v24 = vadd.f32 %v881_v9, %v315_v13  ;;  %v339_v25 = vadd.f32 %v881_v9, %v316_v14  ;;  %vm704_vm1 = vmpackc.low %vm385_vm14, %vm384_vm13  ;;  %vm378_vm2 = vcmp.ge.f32.partialorder %v362_v28, 0.1 }
  0x1f   : > { %v693_v26 = vpack.c.bf16 %v345_v16, %v344_v15  ;;  %v705_v27 = vpack.c.bf16 %v353_v18, %v352_v17  ;;  %vm379_vm3 = vcmp.ge.f32.partialorder %v363_v29, 0.1  ;;  %vm386_vm4 = vcmp.ge.f32.partialorder %v370_v30, 0.1 }
  0x20   : > { %v347_v33 = vmax.f32 %v331_v23, 0.0  ;;  %v354_v9 = vmax.f32 %v338_v24, 0.0  ;;  %v355_v34 = vmax.f32 %v339_v25, 0.0  ;;  %vm387_vm5 = vcmp.ge.f32.partialorder %v371_v31, 0.1  ;;  %vm695_vm6 = vmpackc.low %vm379_vm3, %vm378_vm2 }
  0x21   : > { %739 = vmatpush3.bf16.msra.mxu0 %v789_v32  ;;  %773 = vmatpush3.bf16.msra.mxu1 %v789_v32  ;;  %v346_v32 = vmax.f32 %v330_v22, 0.0  ;;  %vm707_vm7 = vmpackc.low %vm387_vm5, %vm386_vm4 }
  0x22   : > { %740 = vmatprep.subr.bf16.mxu0 %v790_v45  ;;  %766 = vmatprep.subr.bf16.mxu1 %v790_v45  ;;  %v708_v36 = vpack.c.bf16 %v355_v34, %v354_v9 }
  0x23   : > { %v696_v35 = vpack.c.bf16 %v347_v33, %v346_v32 }
  0x25   : > { %741 = vmatpush3.bf16.msra.mxu0 %v790_v45  ;;  %774 = vmatpush3.bf16.msra.mxu1 %v790_v45 }
  0x26   : > { %742 = vmatprep.subr.bf16.mxu0 %v791_v55  ;;  %767 = vmatprep.subr.bf16.mxu1 %v791_v55 }
  0x29   : > { %743 = vmatpush3.bf16.msra.mxu0 %v791_v55  ;;  %775 = vmatpush3.bf16.msra.mxu1 %v791_v55 }
  0x2c   : > { %745 = vmatmul.mubr.msk.bf16.vlgmr.msra.gmra.mxu0 %vm957_vm12, %v690_v20  ;;  %753 = vmatmul.mubr.msk.bf16.vlgmr.msra.gmra.mxu1 %vm963_vm15, %v702_v6 }
  0x2d   : > { %748 = vmatprep.mubr.msk.bf16.mxu0 %vm692_vm0, %v693_v26  ;;  %756 = vmatprep.mubr.msk.bf16.mxu1 %vm704_vm1, %v705_v27 }
  0x34   : > { %749 = vmatmul.mubr.msk.bf16.gmra.mxu0 %vm695_vm6, %v696_v35  ;;  %757 = vmatmul.mubr.msk.bf16.gmra.mxu1 %vm707_vm7, %v708_v36 }
  0xec   : > { %v746_v38 = vpop.f32.mrf.mxu0  ;;  %v754_v39 = vpop.f32.mrf.mxu1 }
  0xed   : > { %v526_v40 = vadd.f32 %v746_v38, %v677_v37  ;;  %v558_v41 = vadd.f32 %v754_v39, %v677_v37 }
  0xee   : > { %v517_v42 = vpop.f32.mrf.mxu0  ;;  %v549_v43 = vpop.f32.mrf.mxu1 }
  0xef   : > { %582 = vst [vmem:[%s986_s9 + $0x10] sm:$0xff] %v526_v40  ;;  %590 = vst [vmem:[%s986_s9 + $0x50] sm:$0xff] %v558_v41  ;;  %v518_v44 = vadd.f32 %v677_v37, %v517_v42  ;;  %v550_v45 = vadd.f32 %v677_v37, %v549_v43 }
  0xf0   : > { %v747_v46 = vpop.f32.mrf.mxu0  ;;  %v755_v47 = vpop.f32.mrf.mxu1 }
  0xf1   : > { %580 = vst [vmem:[%s986_s9] sm:$0xff] %v518_v44  ;;  %588 = vst [vmem:[%s986_s9 + $0x40] sm:$0xff] %v550_v45  ;;  %v529_v48 = vadd.f32 %v747_v46, %v677_v37  ;;  %v561_v49 = vadd.f32 %v755_v47, %v677_v37 }
  0xf2   : > { %v520_v50 = vpop.f32.mrf.mxu0  ;;  %v552_v51 = vpop.f32.mrf.mxu1 }
  0xf3   : > { %583 = vst [vmem:[%s986_s9 + $0x18] sm:$0xff] %v529_v48  ;;  %591 = vst [vmem:[%s986_s9 + $0x58] sm:$0xff] %v561_v49  ;;  %v521_v52 = vadd.f32 %v677_v37, %v520_v50  ;;  %v553_v53 = vadd.f32 %v677_v37, %v552_v51 }
  0xf4   : > { %v750_v54 = vpop.f32.mrf.mxu0  ;;  %v758_v55 = vpop.f32.mrf.mxu1 }
  0xf5   : > { %581 = vst [vmem:[%s986_s9 + $0x8] sm:$0xff] %v521_v52  ;;  %589 = vst [vmem:[%s986_s9 + $0x48] sm:$0xff] %v553_v53  ;;  %v542_v56 = vadd.f32 %v750_v54, %v677_v37  ;;  %v574_v57 = vadd.f32 %v758_v55, %v677_v37 }
  0xf6   : > { %v533_v58 = vpop.f32.mrf.mxu0  ;;  %v565_v59 = vpop.f32.mrf.mxu1 }
  0xf7   : > { %586 = vst [vmem:[%s986_s9 + $0x30] sm:$0xff] %v542_v56  ;;  %594 = vst [vmem:[%s986_s9 + $0x70] sm:$0xff] %v574_v57  ;;  %v534_v60 = vadd.f32 %v677_v37, %v533_v58  ;;  %v566_v61 = vadd.f32 %v677_v37, %v565_v59 }
  0xf8   : > { %v751_v62 = vpop.f32.mrf.mxu0  ;;  %v759_v63 = vpop.f32.mrf.mxu1 }
  0xf9   : > { %584 = vst [vmem:[%s986_s9 + $0x20] sm:$0xff] %v534_v60  ;;  %592 = vst [vmem:[%s986_s9 + $0x60] sm:$0xff] %v566_v61  ;;  %v545_v0 = vadd.f32 %v751_v62, %v677_v37  ;;  %v577_v1 = vadd.f32 %v759_v63, %v677_v37 }
  0xfa   : > { %v536_v2 = vpop.f32.mrf.mxu0  ;;  %v568_v3 = vpop.f32.mrf.mxu1 }
  0xfb   : > { %587 = vst [vmem:[%s986_s9 + $0x38] sm:$0xff] %v545_v0  ;;  %595 = vst [vmem:[%s986_s9 + $0x78] sm:$0xff] %v577_v1  ;;  %v537_v4 = vadd.f32 %v677_v37, %v536_v2  ;;  %v569_v5 = vadd.f32 %v677_v37, %v568_v3 }
  0xfd   : > { %585 = vst [vmem:[%s986_s9 + $0x28] sm:$0xff] %v537_v4  ;;  %593 = vst [vmem:[%s986_s9 + $0x68] sm:$0xff] %v569_v5 }
  0xfe PF: > { %s16_s21 = sadd.s32 1, %s798_s21  }
  0xff   : > { %p13_p4 = scmp.ge.s32.totalorder %s16_s21, 4  }
 0x101   :  { %15 = sbr.rel (!%p13_p4) target bundleno = 1 (0x1), region = 77 }

</bundles_post_ra>
